<compile_context>
chip_gen: v7x
topology: tpu7x:2x2x1
jax: 0.10.0
libtpu: 0.0.40
codegen_flags: <defaults>
</compile_context>

<pallas_src>
import jax
import jax.numpy as jnp
from jax.experimental import pallas as pl
from jax.experimental.pallas import tpu as pltpu


# ----------------------------------------------------------------------------
# small helpers
# ----------------------------------------------------------------------------

def _round_up(x, m):
    return (x + m - 1) // m * m


def _cdiv(a, b):
    return (a + b - 1) // b


def _pick_tile(dim, max_tile, align):
    """Largest multiple of `align` that divides `dim` and is <= max_tile."""
    best = align
    t = align
    while t <= min(dim, max_tile):
        if dim % t == 0:
            best = t
        t += align
    return best


def _select_batch_tile(M, max_tm, min_tiles=1):
    """Batch tile that is a multiple of 8, bounds padding waste to <8 rows/tile,
    and (when min_tiles=2) yields >=2 grid steps so megacore can split them."""
    m8 = _round_up(max(M, 1), 8)
    num_tiles = max(min_tiles, _cdiv(m8, max_tm))
    tm = _round_up(_cdiv(m8, num_tiles), 8)
    return tm, tm * num_tiles


_MAX_TM_FUSED = 512     # fused batch tile cap (weights are resident, x/out scale w/ tm)


# ----------------------------------------------------------------------------
# generation-aware VMEM budgeting
# ----------------------------------------------------------------------------

_VMEM_CAP = None


def _vmem_cap():
    """Physical VMEM per TensorCore (128 MiB on v5e/v6e, 64 MiB on v7x)."""
    global _VMEM_CAP
    if _VMEM_CAP is None:
        try:
            _VMEM_CAP = max(int(pltpu.get_tpu_info().vmem_capacity_bytes), 32 << 20)
        except Exception:
            _VMEM_CAP = 64 << 20          # conservative (v7x-sized) default
    return _VMEM_CAP


def _fused_budget():
    # ~48 MiB on v7x, ~96 MiB on 128-MiB parts; leaves room for Mosaic scratch.
    return (_vmem_cap() * 3) // 4


def _pick_vmem_limit(est):
    return int(min(_vmem_cap() - (8 << 20), max(32 << 20, est + (8 << 20))))


def _max_tm_tiled():
    return 512 if _vmem_cap() >= (96 << 20) else 256


# ----------------------------------------------------------------------------
# Buffered(1) capability probe (single-buffer the constant-index weight specs)
# ----------------------------------------------------------------------------

_BUFFERED_ONE_OK = None


def _buffered_one_supported():
    """Probe whether pipeline_mode=pl.Buffered(1) compiles on this install."""
    global _BUFFERED_ONE_OK
    if _BUFFERED_ONE_OK is None:
        try:
            spec = pl.BlockSpec((8, 128), lambda i: (0, 0),
                                pipeline_mode=pl.Buffered(1))

            def _probe_kernel(x_ref, o_ref):
                o_ref[...] = x_ref[...] + 1.0

            out = pl.pallas_call(
                _probe_kernel,
                out_shape=jax.ShapeDtypeStruct((16, 128), jnp.float32),
                grid=(2,),
                in_specs=[spec],
                out_specs=pl.BlockSpec((8, 128), lambda i: (i, 0)),
            )(jnp.zeros((8, 128), jnp.float32))
            jax.block_until_ready(out)
            _BUFFERED_ONE_OK = True
        except Exception:
            _BUFFERED_ONE_OK = False
    return _BUFFERED_ONE_OK


def _resident_spec(block_shape, index_map):
    """BlockSpec for an input whose block index never changes: single buffer."""
    if _buffered_one_supported():
        return pl.BlockSpec(block_shape, index_map, pipeline_mode=pl.Buffered(1))
    return pl.BlockSpec(block_shape, index_map)


# ----------------------------------------------------------------------------
# VMEM footprint estimates
# ----------------------------------------------------------------------------

def _resident_vmem_estimate(tm, e_pad, h_pad, L):
    bf16, f32 = 2, 4
    rb = 1 if _buffered_one_supported() else 2      # resident-spec buffer count
    d = max(e_pad, h_pad)
    return (2 * tm * e_pad * bf16                   # x tile (double-buffered)
            + rb * e_pad * h_pad * bf16             # W0 (resident)
            + rb * h_pad * f32                      # b0
            + rb * L * h_pad * h_pad * bf16         # hidden weight stack (resident)
            + rb * L * h_pad * f32                  # hidden bias stack
            + 2 * tm * h_pad * f32                  # out tile (double-buffered)
            + 4 * tm * d * f32)                     # activation temporaries headroom


def _stream_vmem_estimate(tm, e_pad, h_pad):
    bf16, f32 = 2, 4
    rb = 1 if _buffered_one_supported() else 2
    d = max(e_pad, h_pad)
    return (2 * tm * e_pad * bf16                   # x tile
            + rb * e_pad * h_pad * bf16             # W0 (resident)
            + rb * h_pad * f32                      # b0
            + 2 * h_pad * h_pad * bf16              # one hidden weight, double-buffered
            + 2 * h_pad * f32                       # its bias
            + 2 * tm * h_pad * f32                  # out tile
            + tm * h_pad * f32                      # h scratch
            + 4 * tm * d * f32)                     # temporaries headroom


# ----------------------------------------------------------------------------
# kernels
# ----------------------------------------------------------------------------

def _make_resident_kernel(num_hidden_layers):
    """Whole layer stack per batch tile; weights resident in VMEM."""
    def kernel(x_ref, w0_ref, b0_ref, *args):
        if num_hidden_layers > 0:
            w_ref, b_ref, o_ref = args
        else:
            (o_ref,) = args
        h = jnp.dot(x_ref[...], w0_ref[...], preferred_element_type=jnp.float32)
        h = jnp.maximum(h + b0_ref[...], 0.0)
        for l in range(num_hidden_layers):       # statically unrolled
            h = jnp.dot(h.astype(jnp.bfloat16), w_ref[l],
                        preferred_element_type=jnp.float32)
            h = jnp.maximum(h + b_ref[l], 0.0)
        o_ref[...] = h.astype(o_ref.dtype)
    return kernel


def _stream_kernel(x_ref, w0_ref, b0_ref, w_ref, b_ref, o_ref, h_ref):
    """Layer-streaming: grid=(batch_tiles, L); activation held in VMEM scratch,
    one hidden layer's weight streamed (double-buffered) per grid step."""
    l = pl.program_id(1)

    @pl.when(l == 0)
    def _():
        h0 = jnp.dot(x_ref[...], w0_ref[...], preferred_element_type=jnp.float32)
        h_ref[...] = jnp.maximum(h0 + b0_ref[...], 0.0)

    h = jnp.dot(h_ref[...].astype(jnp.bfloat16), w_ref[0],
                preferred_element_type=jnp.float32)
    h_ref[...] = jnp.maximum(h + b_ref[0], 0.0)

    @pl.when(l == pl.num_programs(1) - 1)
    def _():
        o_ref[...] = h_ref[...].astype(o_ref.dtype)


def _linear_relu_kernel(x_ref, w_ref, b_ref, o_ref, acc_ref):
    """(M,N,K)-tiled relu(x @ w + b) with an f32 VMEM accumulator."""
    k = pl.program_id(2)

    @pl.when(k == 0)
    def _():
        acc_ref[...] = jnp.zeros_like(acc_ref)

    acc_ref[...] += jnp.dot(x_ref[...], w_ref[...],
                            preferred_element_type=jnp.float32)

    @pl.when(k == pl.num_programs(2) - 1)
    def _():
        o_ref[...] = jnp.maximum(acc_ref[...] + b_ref[...], 0.0).astype(o_ref.dtype)


# ----------------------------------------------------------------------------
# pallas_call wrappers
# ----------------------------------------------------------------------------

def _run_resident(x, packed, *, tm, m_pad):
    w0_p, b0_p, W, B = packed["w0"], packed["b0"], packed["W"], packed["B"]
    e_pad, h_pad = w0_p.shape
    L = 0 if W is None else int(W.shape[0])
    M, E = x.shape

    x_p = jnp.pad(x, ((0, m_pad - M), (0, e_pad - E))).astype(jnp.bfloat16)

    inputs = [x_p, w0_p, b0_p]
    in_specs = [
        pl.BlockSpec((tm, e_pad), lambda i: (i, 0)),          # batch tile of x
        _resident_spec((e_pad, h_pad), lambda i: (0, 0)),     # resident W0
        _resident_spec((1, h_pad), lambda i: (0, 0)),         # resident b0
    ]
    weight_bytes = w0_p.size * 2 + b0_p.size * 4
    if L > 0:
        inputs += [W, B]
        in_specs += [
            _resident_spec((L, h_pad, h_pad), lambda i: (0, 0, 0)),
            _resident_spec((L, 1, h_pad), lambda i: (0, 0, 0)),
        ]
        weight_bytes += W.size * 2 + B.size * 4

    est = _resident_vmem_estimate(tm, e_pad, h_pad, L)
    flops = 2 * m_pad * (e_pad * h_pad + L * h_pad * h_pad)
    bytes_accessed = x_p.size * 2 + weight_bytes + m_pad * h_pad * 4

    return pl.pallas_call(
        _make_resident_kernel(L),
        out_shape=jax.ShapeDtypeStruct((m_pad, h_pad), jnp.float32),
        grid_spec=pltpu.PrefetchScalarGridSpec(
            num_scalar_prefetch=0,
            grid=(m_pad // tm,),
            in_specs=in_specs,
            out_specs=pl.BlockSpec((tm, h_pad), lambda i: (i, 0)),
        ),
        compiler_params=pltpu.CompilerParams(
            dimension_semantics=("parallel",),
            vmem_limit_bytes=_pick_vmem_limit(est)),
        cost_estimate=pl.CostEstimate(flops=int(flops), transcendentals=0,
                                      bytes_accessed=int(bytes_accessed)),
    )(*inputs)


def _run_stream(x, packed, *, tm, m_pad):
    w0_p, b0_p, W, B = packed["w0"], packed["b0"], packed["W"], packed["B"]
    e_pad, h_pad = w0_p.shape
    L = int(W.shape[0])
    M, E = x.shape

    x_p = jnp.pad(x, ((0, m_pad - M), (0, e_pad - E))).astype(jnp.bfloat16)

    est = _stream_vmem_estimate(tm, e_pad, h_pad)
    n_tiles = m_pad // tm
    flops = 2 * m_pad * (e_pad * h_pad + L * h_pad * h_pad)
    bytes_accessed = (x_p.size * 2 + w0_p.size * 2 + b0_p.size * 4
                      + (W.size * 2 + B.size * 4) * n_tiles   # streamed per batch tile
                      + m_pad * h_pad * 4)

    return pl.pallas_call(
        _stream_kernel,
        out_shape=jax.ShapeDtypeStruct((m_pad, h_pad), jnp.float32),
        grid_spec=pltpu.PrefetchScalarGridSpec(
            num_scalar_prefetch=0,
            grid=(n_tiles, L),
            in_specs=[
                pl.BlockSpec((tm, e_pad), lambda i, l: (i, 0)),       # x (const over l)
                _resident_spec((e_pad, h_pad), lambda i, l: (0, 0)),  # resident W0
                _resident_spec((1, h_pad), lambda i, l: (0, 0)),      # resident b0
                pl.BlockSpec((1, h_pad, h_pad), lambda i, l: (l, 0, 0)),  # streamed W[l]
                pl.BlockSpec((1, 1, h_pad), lambda i, l: (l, 0, 0)),      # streamed B[l]
            ],
            out_specs=pl.BlockSpec((tm, h_pad), lambda i, l: (i, 0)),
            scratch_shapes=[pltpu.VMEM((tm, h_pad), jnp.float32)],    # resident activation
        ),
        compiler_params=pltpu.CompilerParams(
            dimension_semantics=("parallel", "arbitrary"),
            vmem_limit_bytes=_pick_vmem_limit(est)),
        cost_estimate=pl.CostEstimate(flops=int(flops), transcendentals=0,
                                      bytes_accessed=int(bytes_accessed)),
    )(x_p, w0_p, b0_p, W, B)


def _linear_relu_padded(x_p, w_p, b_p, *, tm, out_dtype):
    """relu(x_p @ w_p + b_p) on already padded/cast operands (K, N % 128 == 0)."""
    m_pad, k_pad = x_p.shape
    n_pad = w_p.shape[1]
    big_vmem = _vmem_cap() >= (96 << 20)
    tn = _pick_tile(n_pad, 1024 if big_vmem else 512, 128)
    tk = _pick_tile(k_pad, 1024 if big_vmem else 512, 128)

    grid = (m_pad // tm, n_pad // tn, k_pad // tk)
    out_bytes = jnp.dtype(out_dtype).itemsize
    flops = 2 * m_pad * n_pad * k_pad
    bytes_accessed = (x_p.size * x_p.dtype.itemsize + w_p.size * 2 + b_p.size * 4
                      + m_pad * n_pad * out_bytes)

    return pl.pallas_call(
        _linear_relu_kernel,
        out_shape=jax.ShapeDtypeStruct((m_pad, n_pad), out_dtype),
        grid_spec=pltpu.PrefetchScalarGridSpec(
            num_scalar_prefetch=0,
            grid=grid,
            in_specs=[
                pl.BlockSpec((tm, tk), lambda i, j, k: (i, k)),
                pl.BlockSpec((tk, tn), lambda i, j, k: (k, j)),
                pl.BlockSpec((1, tn), lambda i, j, k: (0, j)),
            ],
            out_specs=pl.BlockSpec((tm, tn), lambda i, j, k: (i, j)),
            scratch_shapes=[pltpu.VMEM((tm, tn), jnp.float32)],
        ),
        compiler_params=pltpu.CompilerParams(
            dimension_semantics=("parallel", "parallel", "arbitrary"),
            vmem_limit_bytes=(64 << 20) if big_vmem else (32 << 20)),
        cost_estimate=pl.CostEstimate(flops=int(flops), transcendentals=0,
                                      bytes_accessed=int(bytes_accessed)),
    )(x_p, w_p, b_p)


def _run_tiled_chain(x, packed, *, tm, m_pad):
    """Last-resort per-layer tiled chain; intermediates stay padded and bf16."""
    w0_p, b0_p, W, B = packed["w0"], packed["b0"], packed["W"], packed["B"]
    e_pad, h_pad = w0_p.shape
    L = 0 if W is None else int(W.shape[0])
    M, E = x.shape

    x_p = jnp.pad(x, ((0, m_pad - M), (0, e_pad - E))).astype(jnp.bfloat16)
    h = _linear_relu_padded(x_p, w0_p, b0_p, tm=tm,
                            out_dtype=jnp.bfloat16 if L > 0 else jnp.float32)
    for l in range(L):
        last = (l == L - 1)
        h = _linear_relu_padded(h, W[l], B[l], tm=tm,
                                out_dtype=jnp.float32 if last else jnp.bfloat16)
    return h


# ----------------------------------------------------------------------------
# path selection + forward
# ----------------------------------------------------------------------------

def _choose_path(M, e_pad, h_pad, L, min_tiles, force_path):
    budget = _fused_budget()
    if force_path == "stream" and L == 0:
        force_path = "resident"
    if force_path in ("resident", "stream"):
        tm, m_pad = _select_batch_tile(M, _MAX_TM_FUSED, min_tiles)
        return force_path, tm, m_pad
    if force_path == "tiled":
        tm, m_pad = _select_batch_tile(M, _max_tm_tiled(), min_tiles)
        return "tiled", tm, m_pad

    for max_tm in (_MAX_TM_FUSED, 256, 128):
        tm, m_pad = _select_batch_tile(M, max_tm, min_tiles)
        if _resident_vmem_estimate(tm, e_pad, h_pad, L) <= budget:
            return "resident", tm, m_pad
    if L > 0:
        for max_tm in (_MAX_TM_FUSED, 256, 128):
            tm, m_pad = _select_batch_tile(M, max_tm, min_tiles)
            if _stream_vmem_estimate(tm, e_pad, h_pad) <= budget:
                return "stream", tm, m_pad
    tm, m_pad = _select_batch_tile(M, _max_tm_tiled(), min_tiles)
    return "tiled", tm, m_pad


def _mmlp_forward_impl(x, packed, hidden_dim, force_path=None):
    w0_p = packed["w0"]
    e_pad, h_pad = int(w0_p.shape[0]), int(w0_p.shape[1])
    W = packed["W"]
    L = 0 if W is None else int(W.shape[0])
    M, E = x.shape
    assert e_pad == _round_up(E, 128), "x feature dim does not match packed params"

    # >=2 batch tiles (batch >= 128) so the "parallel" axis can use both v7x TCs.
    min_tiles = 2 if _round_up(M, 8) >= 128 else 1
    path, tm, m_pad = _choose_path(M, e_pad, h_pad, L, min_tiles, force_path)

    if path == "resident":
        out = _run_resident(x, packed, tm=tm, m_pad=m_pad)
    elif path == "stream":
        out = _run_stream(x, packed, tm=tm, m_pad=m_pad)
    else:
        out = _run_tiled_chain(x, packed, tm=tm, m_pad=m_pad)
    # TODO(synk): output kept f32 to match the PyTorch module; switch to bf16 if
    # downstream accepts it (halves output HBM writeback).
    return out[:M, :hidden_dim]


mmlp_forward = jax.jit(_mmlp_forward_impl, static_argnames=("hidden_dim", "force_path"))


# ----------------------------------------------------------------------------
# params: init, one-time packing, reference
# ----------------------------------------------------------------------------

def init_mmlp_params(key, embedding_dim, hidden_dim, layers):
    """nn.Linear-like init; weights stored as [in_features, out_features]."""
    params = {}
    key, k_w, k_b = jax.random.split(key, 3)
    lim = 1.0 / jnp.sqrt(embedding_dim)
    params["input_fc"] = (
        jax.random.uniform(k_w, (embedding_dim, hidden_dim), jnp.float32, -lim, lim),
        jax.random.uniform(k_b, (hidden_dim,), jnp.float32, -lim, lim),
    )
    mlayers = []
    lim_h = 1.0 / jnp.sqrt(hidden_dim)
    for _ in range(layers):
        key, k_w, k_b = jax.random.split(key, 3)
        mlayers.append((
            jax.random.uniform(k_w, (hidden_dim, hidden_dim), jnp.float32, -lim_h, lim_h),
            jax.random.uniform(k_b, (hidden_dim,), jnp.float32, -lim_h, lim_h),
        ))
    params["mlayers"] = mlayers
    return params


def prepare_params(params):
    """Pad + cast + stack the weights ONCE (call outside the forward pass)."""
    _buffered_one_supported()                      # warm capability probe
    w0, b0 = params["input_fc"]
    mlayers = params["mlayers"]
    E, H = int(w0.shape[0]), int(w0.shape[1])
    L = len(mlayers)
    e_pad, h_pad = _round_up(E, 128), _round_up(H, 128)

    packed = {
        "w0": jnp.pad(w0, ((0, e_pad - E), (0, h_pad - H))).astype(jnp.bfloat16),
        "b0": jnp.pad(b0, (0, h_pad - H)).astype(jnp.float32).reshape(1, h_pad),
        "W": None,
        "B": None,
    }
    if L > 0:
        packed["W"] = jnp.stack(
            [jnp.pad(w, ((0, h_pad - H), (0, h_pad - H))) for (w, _) in mlayers]
        ).astype(jnp.bfloat16)
        packed["B"] = jnp.stack(
            [jnp.pad(b, (0, h_pad - H)).reshape(1, h_pad) for (_, b) in mlayers]
        ).astype(jnp.float32)
    return packed


def mmlp_reference(x, params, *, bf16_inputs=False):
    """Pure-JAX reference. bf16_inputs=True mimics the kernels' quantization."""
    cast = (lambda a: a.astype(jnp.bfloat16)) if bf16_inputs else (lambda a: a)
    w0, b0 = params["input_fc"]
    h = jnp.maximum(
        jnp.dot(cast(x), cast(w0), preferred_element_type=jnp.float32) + b0, 0.0)
    for (w, b) in params["mlayers"]:
        h = jnp.maximum(
            jnp.dot(cast(h), cast(w), preferred_element_type=jnp.float32) + b, 0.0)
    return h


# ----------------------------------------------------------------------------
# main
# ----------------------------------------------------------------------------

if __name__ == "__main__":
    key = jax.random.PRNGKey(0)

    # --- Config 1: small shapes consistent with the module's forward ---------
    batch, E, H, L = 8, 16, 32, 2
    key, k_x, k_p = jax.random.split(key, 3)
    x = jax.random.normal(k_x, (batch, E), jnp.float32)
    params = init_mmlp_params(k_p, E, H, L)
    packed = prepare_params(params)

    out = jax.block_until_ready(mmlp_forward(x, packed, hidden_dim=H))
    assert out.shape == (batch, H)
    ref_q = mmlp_reference(x, params, bf16_inputs=True)
    ref_f = mmlp_reference(x, params, bf16_inputs=False)
    assert jnp.allclose(out, ref_q, atol=1e-3, rtol=1e-3), "resident mismatch (small)"
    assert jnp.allclose(out, ref_f, atol=5e-2, rtol=5e-2), "drift vs f32 (small)"

    # --- Config 2: lane-aligned shapes, multi-tile batch (megacore split) ----
    batch2, E2, H2, L2 = 512, 256, 512, 3
    key, k_x2, k_p2 = jax.random.split(key, 3)
    x2 = jax.random.normal(k_x2, (batch2, E2), jnp.float32)
    params2 = init_mmlp_params(k_p2, E2, H2, L2)
    packed2 = prepare_params(params2)
    ref2_q = mmlp_reference(x2, params2, bf16_inputs=True)
    ref2_f = mmlp_reference(x2, params2, bf16_inputs=False)

    out2 = jax.block_until_ready(mmlp_forward(x2, packed2, hidden_dim=H2))
    assert out2.shape == (batch2, H2)
    assert jnp.allclose(out2, ref2_q, atol=1e-3, rtol=1e-3), "resident mismatch (medium)"
    assert jnp.allclose(out2, ref2_f, atol=5e-2, rtol=5e-2), "drift vs f32 (medium)"

    # --- Config 3: exercise the layer-streaming fused path -------------------
    out2s = jax.block_until_ready(
        mmlp_forward(x2, packed2, hidden_dim=H2, force_path="stream"))
    assert jnp.allclose(out2s, ref2_q, atol=1e-3, rtol=1e-3), "stream mismatch"

    # --- Config 4: exercise the per-layer tiled fallback path ----------------
    out2t = jax.block_until_ready(
        mmlp_forward(x2, packed2, hidden_dim=H2, force_path="tiled"))
    assert jnp.allclose(out2t, ref2_q, atol=2e-3, rtol=2e-3), "tiled mismatch"

    print("KERNEL_OK")
</pallas_src>

<mosaic_0001>
module attributes {stable_mosaic.version = 11 : i64} {
  func.func @_probe_kernel(%arg0: i32, %arg1: memref<8x128xf32, #tpu.memory_space<vmem>>, %arg2: memref<8x128xf32, #tpu.memory_space<vmem>>) attributes {dimension_semantics = [#tpu.dimension_semantics<arbitrary>], iteration_bounds = array<i64: 2>, scalar_prefetch = 0 : i64, scratch_operands = 0 : i64, tpu.core_type = #tpu.core_type<tc>, window_params = [{pipeline_mode = #tpu.pipeline_mode<synchronous>, transform_indices = @transform_0, window_bounds = array<i64: 8, 128>}, {transform_indices = @transform_1, window_bounds = array<i64: 8, 128>}]} {
    %c0 = arith.constant 0 : index
    %c0_0 = arith.constant 0 : index
    %0 = vector.load %arg1[%c0, %c0_0] : memref<8x128xf32, #tpu.memory_space<vmem>>, vector<8x128xf32>
    %cst = arith.constant 1.000000e+00 : f32
    %1 = vector.broadcast %cst : f32 to vector<8x128xf32>
    %2 = arith.addf %0, %1 : vector<8x128xf32>
    %c0_1 = arith.constant 0 : index
    %c0_2 = arith.constant 0 : index
    %3 = vector.load %arg2[%c0_1, %c0_2] : memref<8x128xf32, #tpu.memory_space<vmem>>, vector<8x128xf32>
    tpu.vector_store %arg2[%c0_1, %c0_2], %2 {strides = array<i32>} : memref<8x128xf32, #tpu.memory_space<vmem>>, vector<8x128xf32>,
    return
  }
  func.func @transform_0(%arg0: i32) -> (i32, i32) {
    %c0_i32 = arith.constant 0 : i32
    %c0_i32_0 = arith.constant 0 : i32
    %c0_i32_1 = arith.constant 0 : i32
    return %c0_i32, %c0_i32_0 : i32, i32
  }
  func.func @transform_1(%arg0: i32) -> (i32, i32) {
    %c0_i32 = arith.constant 0 : i32
    %c0_i32_0 = arith.constant 0 : i32
    return %arg0, %c0_i32 : i32, i32
  }
}

module attributes {stable_mosaic.version = 11 : i64} {
  func.func @kernel(%arg0: i32, %arg1: memref<8x128xbf16, #tpu.memory_space<vmem>>, %arg2: memref<128x128xbf16, #tpu.memory_space<vmem>>, %arg3: memref<1x128xf32, #tpu.memory_space<vmem>>, %arg4: memref<2x128x128xbf16, #tpu.memory_space<vmem>>, %arg5: memref<2x1x128xf32, #tpu.memory_space<vmem>>, %arg6: memref<8x128xf32, #tpu.memory_space<vmem>>) attributes {dimension_semantics = [#tpu.dimension_semantics<parallel>], iteration_bounds = array<i64: 1>, scalar_prefetch = 0 : i64, scratch_operands = 0 : i64, tpu.core_type = #tpu.core_type<tc>, window_params = [{transform_indices = @transform_0, window_bounds = array<i64: 8, 128>}, {pipeline_mode = #tpu.pipeline_mode<synchronous>, transform_indices = @transform_1, window_bounds = array<i64: 128, 128>}, {pipeline_mode = #tpu.pipeline_mode<synchronous>, transform_indices = @transform_2, window_bounds = array<i64: 1, 128>}, {pipeline_mode = #tpu.pipeline_mode<synchronous>, transform_indices = @transform_3, window_bounds = array<i64: 2, 128, 128>}, {pipeline_mode = #tpu.pipeline_mode<synchronous>, transform_indices = @transform_4, window_bounds = array<i64: 2, 1, 128>}, {transform_indices = @transform_5, window_bounds = array<i64: 8, 128>}]} {
    %c0 = arith.constant 0 : index
    %c0_0 = arith.constant 0 : index
    %0 = vector.load %arg1[%c0, %c0_0] : memref<8x128xbf16, #tpu.memory_space<vmem>>, vector<8x128xbf16>
    %c0_1 = arith.constant 0 : index
    %c0_2 = arith.constant 0 : index
    %1 = vector.load %arg2[%c0_1, %c0_2] : memref<128x128xbf16, #tpu.memory_space<vmem>>, vector<128x128xbf16>
    %cst = arith.constant dense<0.000000e+00> : vector<8x128xf32>
    %2 = tpu.matmul %0, %1, %cst {dimension_numbers = #tpu.dot_dimension_numbers<[1], [0], [0], [1], [0, 0, 1, 1], [], []>} : vector<8x128xbf16>, vector<128x128xbf16>, vector<8x128xf32> -> vector<8x128xf32>
    %c0_3 = arith.constant 0 : index
    %c0_4 = arith.constant 0 : index
    %3 = vector.load %arg3[%c0_3, %c0_4] : memref<1x128xf32, #tpu.memory_space<vmem>>, vector<1x128xf32>
    %4 = vector.broadcast %3 : vector<1x128xf32> to vector<8x128xf32>
    %5 = arith.addf %2, %4 : vector<8x128xf32>
    %cst_5 = arith.constant 0.000000e+00 : f32
    %6 = vector.broadcast %cst_5 : f32 to vector<8x128xf32>
    %7 = arith.maximumf %5, %6 : vector<8x128xf32>
    %8 = arith.truncf %7 : vector<8x128xf32> to vector<8x128xbf16>
    %c0_6 = arith.constant 0 : index
    %c0_7 = arith.constant 0 : index
    %c0_8 = arith.constant 0 : index
    %9 = vector.load %arg4[%c0_6, %c0_7, %c0_8] : memref<2x128x128xbf16, #tpu.memory_space<vmem>>, vector<1x128x128xbf16>
    %10 = vector.shape_cast %9 : vector<1x128x128xbf16> to vector<128x128xbf16>
    %cst_9 = arith.constant dense<0.000000e+00> : vector<8x128xf32>
    %11 = tpu.matmul %8, %10, %cst_9 {dimension_numbers = #tpu.dot_dimension_numbers<[1], [0], [0], [1], [0, 0, 1, 1], [], []>} : vector<8x128xbf16>, vector<128x128xbf16>, vector<8x128xf32> -> vector<8x128xf32>
    %c0_10 = arith.constant 0 : index
    %c0_11 = arith.constant 0 : index
    %c0_12 = arith.constant 0 : index
    %12 = vector.load %arg5[%c0_10, %c0_11, %c0_12] : memref<2x1x128xf32, #tpu.memory_space<vmem>>, vector<1x1x128xf32>
    %13 = vector.shape_cast %12 : vector<1x1x128xf32> to vector<1x128xf32>
    %14 = vector.broadcast %13 : vector<1x128xf32> to vector<8x128xf32>
    %15 = arith.addf %11, %14 : vector<8x128xf32>
    %cst_13 = arith.constant 0.000000e+00 : f32
    %16 = vector.broadcast %cst_13 : f32 to vector<8x128xf32>
    %17 = arith.maximumf %15, %16 : vector<8x128xf32>
    %18 = arith.truncf %17 : vector<8x128xf32> to vector<8x128xbf16>
    %c1 = arith.constant 1 : index
    %c0_14 = arith.constant 0 : index
    %c0_15 = arith.constant 0 : index
    %19 = vector.load %arg4[%c1, %c0_14, %c0_15] : memref<2x128x128xbf16, #tpu.memory_space<vmem>>, vector<1x128x128xbf16>
    %20 = vector.shape_cast %19 : vector<1x128x128xbf16> to vector<128x128xbf16>
    %cst_16 = arith.constant dense<0.000000e+00> : vector<8x128xf32>
    %21 = tpu.matmul %18, %20, %cst_16 {dimension_numbers = #tpu.dot_dimension_numbers<[1], [0], [0], [1], [0, 0, 1, 1], [], []>} : vector<8x128xbf16>, vector<128x128xbf16>, vector<8x128xf32> -> vector<8x128xf32>
    %c1_17 = arith.constant 1 : index
    %c0_18 = arith.constant 0 : index
    %c0_19 = arith.constant 0 : index
    %22 = vector.load %arg5[%c1_17, %c0_18, %c0_19] : memref<2x1x128xf32, #tpu.memory_space<vmem>>, vector<1x1x128xf32>
    %23 = vector.shape_cast %22 : vector<1x1x128xf32> to vector<1x128xf32>
    %24 = vector.broadcast %23 : vector<1x128xf32> to vector<8x128xf32>
    %25 = arith.addf %21, %24 : vector<8x128xf32>
    %cst_20 = arith.constant 0.000000e+00 : f32
    %26 = vector.broadcast %cst_20 : f32 to vector<8x128xf32>
    %27 = arith.maximumf %25, %26 : vector<8x128xf32>
    %c0_21 = arith.constant 0 : index
    %c0_22 = arith.constant 0 : index
    %28 = vector.load %arg6[%c0_21, %c0_22] : memref<8x128xf32, #tpu.memory_space<vmem>>, vector<8x128xf32>
    tpu.vector_store %arg6[%c0_21, %c0_22], %27 {strides = array<i32>} : memref<8x128xf32, #tpu.memory_space<vmem>>, vector<8x128xf32>,
    return
  }
  func.func @transform_0(%arg0: i32) -> (i32, i32) {
    %c0_i32 = arith.constant 0 : i32
    %c0_i32_0 = arith.constant 0 : i32
    return %arg0, %c0_i32 : i32, i32
  }
  func.func @transform_1(%arg0: i32) -> (i32, i32) {
    %c0_i32 = arith.constant 0 : i32
    %c0_i32_0 = arith.constant 0 : i32
    %c0_i32_1 = arith.constant 0 : i32
    return %c0_i32, %c0_i32_0 : i32, i32
  }
  func.func @transform_2(%arg0: i32) -> (i32, i32) {
    %c0_i32 = arith.constant 0 : i32
    %c0_i32_0 = arith.constant 0 : i32
    %c0_i32_1 = arith.constant 0 : i32
    return %c0_i32, %c0_i32_0 : i32, i32
  }
  func.func @transform_3(%arg0: i32) -> (i32, i32, i32) {
    %c0_i32 = arith.constant 0 : i32
    %c0_i32_0 = arith.constant 0 : i32
    %c0_i32_1 = arith.constant 0 : i32
    %c0_i32_2 = arith.constant 0 : i32
    return %c0_i32, %c0_i32_0, %c0_i32_1 : i32, i32, i32
  }
  func.func @transform_4(%arg0: i32) -> (i32, i32, i32) {
    %c0_i32 = arith.constant 0 : i32
    %c0_i32_0 = arith.constant 0 : i32
    %c0_i32_1 = arith.constant 0 : i32
    %c0_i32_2 = arith.constant 0 : i32
    return %c0_i32, %c0_i32_0, %c0_i32_1 : i32, i32, i32
  }
  func.func @transform_5(%arg0: i32) -> (i32, i32) {
    %c0_i32 = arith.constant 0 : i32
    %c0_i32_0 = arith.constant 0 : i32
    return %arg0, %c0_i32 : i32, i32
  }
}

</mosaic_0001>

<bundles_post_ra>
// kernel: tpu_custom_call.1
= control target key start
LH: loop header
LB: loop body
LE: loop exit
PB: predicated region body
PF: predicated region fallthrough
CT: control target
= control target key end

     0   :  { %6 = vsyncpa [#allocation3], 0  ;;  %s482_s0 = inlined_call_operand.hbm [shape: f32[8,128], index: 0, kind: input, shape index: {}]   ;;  %s483_s1 = inlined_call_operand.hbm [shape: f32[16,128], index: 1, kind: output, shape index: {}]  }
   0x1   :  { %7 = vsyncpa [#allocation4], 0 }
   0x2   :  { %9 = vsyncpa [#allocation4 + $0x1], 0  ;;  %s352_s6 = smov 0   ;;  %s354_s7 = smov 0  }
   0x3   :  { %s356_s8 = smov 0   ;;  %s358_s9 = smov 0  }
   0x4 LB: > { %s373_s10 = sadd.s32 4294967295, %s338_s9   ;;  %s184_s11 = sadd.s32 4294967294, %s338_s9   ;;  %s338_s9 = sphi %s358_s9, %s499_s9   ;;  %s334_s8 = sphi %s356_s8, %s498_s8   ;;  %s330_s7 = sphi %s354_s7, %s497_s7   ;;  %s326_s6 = sphi %s352_s6, %s496_s6  }
   0x5   : > { %s377_s12 = sadd.s32 1, %s338_s9   ;;  %s43_s13 = sadd.s32 1, %s334_s8 }
   0x6   : > { %s40_s14 = ssub.s32 %s338_s9, %s377_s12  ;;  %p53_p0 = scmp.ne.s32.totalorder %s334_s8, %s330_s7 }
   0x7   : > { %p41_p1 = scmp.eq.s32.totalorder %s40_s14, 0  ;;  %p54_p2 = scmp.eq.s32.totalorder %s373_s10, 1 }
   0x8   : > { %p59_p3 = scmp.ne.s32.totalorder %s330_s7, %s326_s6  ;;  %p60_p4 = scmp.eq.s32.totalorder %s184_s11, 1 }
   0x9   : > { %s388_s15 = scalar_select %p41_p1, %s334_s8, %s43_s13  }
   0xa   : > { %p390_p5 = por %p54_p2, %p53_p0  ;;  %p394_p6 = por %p60_p4, %p59_p3 }
   0xb   : > { %p185_p7 = scmp.ge.s32.totalorder %s338_s9, 1  ;;  %p67_p8 = scmp.lt.s32.totalorder %s338_s9, 3 }
   0xc   : > { %s487_s16 = scalar_select %p390_p5, 1, 0 }
   0xd   : > { %s488_s17 = scalar_select %p394_p6, 1, 0 }
   0xe   : > { %p484_p9 = scmp.eq.s32.totalorder %s373_s10, 0  ;;  %p401_p10 = pnand %p185_p7, %p67_p8 }
   0xf   : > { %s340_s19 = smov [#allocation2]   ;;  %s244_s24 = scalar_lea.hbm %s482_s0, 128 }
  0x10   : > { %s489_s18 = scalar_select %p401_p10, 1, 0 }
  0x11   : > { %s80_s20 = sshll.u32 %s340_s19, 4  ;;  %p200_p11 = pneg %p401_p10  ;;  %s81_s20 = int_to_ptr.vmem [resolvable:$true] %s80_s20 }
  0x12   : > { %p245_p13 = scmp.ne.s32.totalorder %s482_s0, %s244_s24  ;;  %p251_p3 = scmp.lt.u32.totalorder %s244_s24, %s482_s0 }
  0x13   : > { %p409_p12 = pnand %p484_p9, %p200_p11 }
  0x15   : > { %p246_p0 = pneg %p409_p12 }
  0x17   : > { %p247_p1 = pnand %p246_p0, %p245_p13 }
  0x19   : > { %p248_p2 = pneg %p247_p1 }
  0x1b   : > { %p253_p4 = pnand %p251_p3, %p248_p2 }
  0x1d   : > { %256 = shalt.err (!%p253_p4)
}
  0x1e   : > { %s257_s29 = scalar_lea.vmem %s81_s20, 128  ;;  %p265_p9 = scmp.lt.s32.totalorder %s81_s20, %s81_s20 }
  0x1f   : > { %p258_p7 = scmp.ne.s32.totalorder %s81_s20, %s257_s29  ;;  %p266_p6 = scmp.lt.s32.totalorder %s257_s29, %s257_s29 }
  0x21   : > { %p260_p8 = pnand %p258_p7, %p246_p0  ;;  %p267_p5 = por %p266_p6, %p265_p9 }
  0x23   : > { %p261_p11 = pneg %p260_p8 }
  0x25   : > { %p268_p10 = pnand %p267_p5, %p261_p11 }
  0x27   : > { %271 = shalt.err (!%p268_p10)
}
  0x28   : > { %203 = dma.hbm_to_vmem [thread:$0]  (!%p409_p12), %s482_s0, 128, %s81_s20, [#allocation3]  }
  0x29   : > { %p491_p13 = scmp.ne.s32.totalorder %s489_s18, 0 }
  0x2a   : > { %p492_p1 = scmp.eq.s32.totalorder (!%p491_p13), %s373_s10, 0 }
  0x2b   : > { %93 = sbr.rel (%p491_p13) target bundleno = 77 (0x4d), region = 24 }
  0x32   : > { %317 = dma.done.wait (%p492_p1), [#allocation3], 128   ;;  %p493_p0 = pmov %p492_p1 }
  0x33   : > { %s105_s3 = sand.u32 1, %s330_s7   ;;  %s191_s13 = sshll.u32 %s373_s10, 7  ;;  %v108_v0 = vld [vmem:[#allocation2] sm:$0xff] }
  0x34   : > { %319 = vsyncadd (%p493_p0), [#allocation3], 4294967168  ;;  %s189_s4 = sshll.u32 %s105_s3, 3  ;;  %v109_v1 = vadd.f32 1.0, %v108_v0  ;;  %s442_s19 = scalar_lea.hbm %s483_s1, %s191_s13 }
  0x35   : > { %s107_s5 = scalar_lea.vmem [#allocation5], %s189_s4  ;;  %s112_s20 = scalar_lea.sflag [#allocation4], %s105_s3 }
  0x36   : > { %s125_s11 = sshll.u32 %s107_s5, 4  ;;  %110 = vst [vmem:[%s107_s5] sm:$0xff] %v109_v1  ;;  %p494_p6 = scmp.ne.s32.totalorder %s487_s16, 0  ;;  %s437_s11 = int_to_ptr.vmem [resolvable:$true] %s125_s11 }
  0x37   : > { %s272_s21 = scalar_lea.vmem %s437_s11, 128  ;;  %s341_s10 = smov [#allocation5]  }
  0x38   : > { %p273_p5 = scmp.ne.s32.totalorder %s437_s11, %s272_s21  ;;  %s276_s22 = sshll.u32 %s341_s10, 4  ;;  %s277_s22 = int_to_ptr.vmem [resolvable:$false] %s276_s22 }
  0x39   : > { %s278_s23 = scalar_lea.vmem %s277_s22, 256  ;;  %p279_p12 = scmp.lt.s32.totalorder %s437_s11, %s277_s22 }
  0x3a   : > { %p274_p9 = pnand %p273_p5, %p494_p6  ;;  %p280_p2 = scmp.lt.s32.totalorder %s278_s23, %s272_s21 }
  0x3c   : > { %p275_p10 = pneg %p274_p9  ;;  %p281_p3 = por %p280_p2, %p279_p12 }
  0x3e   : > { %p282_p4 = pnand %p281_p3, %p275_p10 }
  0x40   : > { %285 = shalt.err (!%p282_p4)
}
  0x41   : > { %s286_s24 = scalar_lea.hbm %s442_s19, 128  ;;  %s290_s27 = scalar_lea.hbm %s483_s1, 256 }
  0x42   : > { %p287_p7 = scmp.ne.s32.totalorder %s442_s19, %s286_s24  ;;  %p291_p13 = scmp.lt.u32.totalorder %s442_s19, %s483_s1 }
  0x43   : > { %p292_p1 = scmp.lt.u32.totalorder %s290_s27, %s286_s24  ;;  %p294_p5 = scmp.lt.u32.totalorder %s286_s24, %s442_s19 }
  0x44   : > { %p288_p8 = pnand %p287_p7, %p494_p6 }
  0x45   : > { %p293_p0 = por %p292_p1, %p291_p13 }
  0x46   : > { %p289_p11 = pneg %p288_p8 }
  0x47   : > { %p295_p9 = por %p294_p5, %p293_p0 }
  0x49   : > { %p296_p10 = pnand %p295_p9, %p289_p11 }
  0x4b   : > { %299 = shalt.err (!%p296_p10)
}
  0x4c   : > { %198 = dma.vmem_to_hbm [thread:$0]  (%p494_p6), %s437_s11, 128, %s442_s19, %s112_s20  }
  0x4d PF: > { %p210_p12 = scmp.ge.s32.totalorder %s338_s9, 2  ;;  %s137_s30 = sand.u32 1, %s326_s6  }
  0x4e   : > { %p495_p2 = scmp.ne.s32.totalorder %s488_s17, 0  ;;  %s138_s2 = scalar_lea.sflag [#allocation4], %s137_s30 }
  0x50   : > { %p205_p3 = pnand %p210_p12, %p495_p2 }
  0x52   : > { %321 = dma.done.wait (!%p205_p3), %s138_s2, 128  }
  0x53   : > { %323 = vsyncadd (!%p205_p3), %s138_s2, 4294967168  ;;  %p12_p4 = scmp.ge.s32.totalorder %s377_s12, 4   ;;  %s496_s6 = smov %s330_s7 }
  0x54   : > { %s497_s7 = smov %s334_s8  ;;  %s498_s8 = smov %s388_s15 }
  0x55   : > { %s499_s9 = smov %s377_s12  ;;  %14 = sbr.rel (!%p12_p4) target bundleno = 4 (0x4), region = 61 }
  0x5c   :  { %143 = vsyncpa [#allocation3], 1 }
  0x5d   :  { %145 = vsyncpa [#allocation3 + $0x1], 1 }
  0x5e   :  { %146 = vsyncpa [#allocation4], 1 }
  0x5f   :  { %148 = vsyncpa [#allocation4 + $0x1], 1 }

// kernel: _mmlp_forward_impl.1
= control target key start
LH: loop header
LB: loop body
LE: loop exit
PB: predicated region body
PF: predicated region fallthrough
CT: control target
= control target key end

     0   :  { %10 = vsyncpa [#allocation3], 0  ;;  %s741_s0 = inlined_call_operand.vmem [shape: bf16[8,128], index: 0, kind: input, shape index: {}]   ;;  %s742_s1 = inlined_call_operand.hbm [shape: bf16[128,128], index: 1, kind: input, shape index: {}]   ;;  %s743_s2 = inlined_call_operand.vmem [shape: f32[1,128], index: 2, kind: input, shape index: {}]   ;;  %s744_s3 = inlined_call_operand.hbm [shape: bf16[2,128,128], index: 3, kind: input, shape index: {}]   ;;  %s745_s4 = inlined_call_operand.vmem [shape: f32[2,1,128], index: 4, kind: input, shape index: {}]   ;;  %s746_s5 = inlined_call_operand.hbm [shape: f32[8,128], index: 5, kind: output, shape index: {}]  }
   0x1   :  { %11 = vsyncpa [#allocation6], 0 }
   0x2   :  { %12 = vsyncpa [#allocation4], 0  ;;  %s626_s18 = smov [#allocation2]   ;;  %s554_s22 = scalar_lea.hbm %s742_s1, 1024 }
   0x3   :  { %s20_s19 = sshll.u32 %s626_s18, 4  ;;  %p555_p0 = scmp.ne.s32.totalorder %s742_s1, %s554_s22  ;;  %s21_s19 = int_to_ptr.vmem [resolvable:$true] %s20_s19 }
   0x4   :  { %p558_p1 = scmp.lt.u32.totalorder %s554_s22, %s742_s1 }
   0x6   :  { %p560_p2 = pnand %p558_p1, %p555_p0 }
   0x8   :  { %563 = shalt.err (!%p560_p2)
}
   0x9   :  { %s564_s27 = scalar_lea.vmem %s21_s19, 1024  ;;  %p569_p4 = scmp.lt.s32.totalorder %s21_s19, %s21_s19 }
   0xa   :  { %p565_p3 = scmp.ne.s32.totalorder %s21_s19, %s564_s27  ;;  %p570_p5 = scmp.lt.s32.totalorder %s564_s27, %s564_s27 }
   0xc   :  { %p571_p6 = por %p570_p5, %p569_p4 }
   0xe   :  { %p572_p7 = pnand %p571_p6, %p565_p3 }
  0x10   :  { %575 = shalt.err (!%p572_p7)
}
  0x11   :  { %s627_s28 = smov 64   ;;  %s628_s29 = smov 4  }
  0x12   :  { %26 = dma.hbm_to_vmem [thread:$0]  %s742_s1, 1024, %s21_s19, [#allocation3], %s627_s28, %s627_s28, %s628_s29  }
  0x13   :  { %s629_s7 = smov [#allocation5]   ;;  %s576_s11 = scalar_lea.hbm %s744_s3, 2048 }
  0x14   :  { %s34_s8 = sshll.u32 %s629_s7, 4  ;;  %p577_p8 = scmp.ne.s32.totalorder %s744_s3, %s576_s11  ;;  %s35_s8 = int_to_ptr.vmem [resolvable:$true] %s34_s8 }
  0x15   :  { %p580_p9 = scmp.lt.u32.totalorder %s576_s11, %s744_s3 }
  0x17   :  { %p582_p10 = pnand %p580_p9, %p577_p8 }
  0x19   :  { %585 = shalt.err (!%p582_p10)
}
  0x1a   :  { %s586_s16 = scalar_lea.vmem %s35_s8, 2048  ;;  %p591_p12 = scmp.lt.s32.totalorder %s35_s8, %s35_s8 }
  0x1b   :  { %p587_p11 = scmp.ne.s32.totalorder %s35_s8, %s586_s16  ;;  %p592_p13 = scmp.lt.s32.totalorder %s586_s16, %s586_s16 }
  0x1d   :  { %p593_p0 = por %p592_p13, %p591_p12 }
  0x1f   :  { %p594_p1 = pnand %p593_p0, %p587_p11 }
  0x21   :  { %597 = shalt.err (!%p594_p1)
}
  0x22   :  { %40 = dma.hbm_to_vmem [thread:$0]  %s744_s3, 2048, %s35_s8, [#allocation6], %s627_s28, %s627_s28, %s628_s29  }
  0x23   :  { %620 = dma.done.wait [#allocation3], 1024  }
  0x24   :  { %621 = vsyncadd [#allocation3], 4294966272 }
  0x25   :  { %622 = dma.done.wait [#allocation6], 2048  }
  0x26   :  { %623 = vsyncadd [#allocation6], 4294965248  ;;  %v630_v0 = vmov 0.0   ;;  %vm631_vm0 = vmmov 0   ;;  %v530_v1 = vld [vmem:[#allocation2] sm:$0xff]   ;;  %v531_v2 = vld [vmem:[#allocation2 + $0x8] sm:$0xff]  }
  0x27   :  { %463 = vmatprep.subr.bf16.mxu0 %v630_v0  ;;  %479 = vmatprep.mubr.msk.bf16.mxu0 %vm631_vm0, %v630_v0  ;;  %v532_v3 = vld [vmem:[#allocation2 + $0x10] sm:$0xff]   ;;  %v538_v4 = vld [vmem:[#allocation5] sm:$0xff]   ;;  %v533_v5 = vld [vmem:[#allocation2 + $0x18] sm:$0xff]   ;;  %s632_s23 = smov [#allocation7]  }
  0x28   :  { %483 = vmatprep.subr.bf16.mxu1 %v630_v0  ;;  %499 = vmatprep.mubr.msk.bf16.mxu1 %vm631_vm0, %v630_v0  ;;  %v539_v6 = vld [vmem:[#allocation5 + $0x8] sm:$0xff]   ;;  %v534_v7 = vld [vmem:[#allocation2 + $0x20] sm:$0xff]   ;;  %v540_v8 = vld [vmem:[#allocation5 + $0x10] sm:$0xff]   ;;  %s398_s24 = sshll.u32 %s632_s23, 4  ;;  %s399_s24 = int_to_ptr.vmem [resolvable:$true] %s398_s24 }
  0x29   :  { %464 = vmatpush3.bf16.msra.mxu0 %v530_v1  ;;  %484 = vmatpush3.bf16.msra.mxu1 %v538_v4  ;;  %v535_v9 = vld [vmem:[#allocation2 + $0x28] sm:$0xff]   ;;  %v541_v10 = vld [vmem:[#allocation5 + $0x18] sm:$0xff]   ;;  %v536_v11 = vld [vmem:[#allocation2 + $0x30] sm:$0xff]   ;;  %s598_s25 = scalar_lea.vmem %s399_s24, 128  ;;  %p603_p3 = scmp.lt.s32.totalorder %s399_s24, %s399_s24 }
  0x2a   :  { %465 = vmatprep.subr.bf16.mxu0 %v630_v0  ;;  %485 = vmatprep.subr.bf16.mxu1 %v630_v0  ;;  %v542_v12 = vld [vmem:[#allocation5 + $0x20] sm:$0xff]   ;;  %v537_v13 = vld [vmem:[#allocation2 + $0x38] sm:$0xff]   ;;  %v543_v14 = vld [vmem:[#allocation5 + $0x28] sm:$0xff]   ;;  %p599_p2 = scmp.ne.s32.totalorder %s399_s24, %s598_s25  ;;  %p604_p4 = scmp.lt.s32.totalorder %s598_s25, %s598_s25 }
  0x2b   :  { %v50_v15 = vld [vmem:[%s741_s0] sm:$0xf]  ;;  %v545_v17 = vld [vmem:[#allocation5 + $0x38] sm:$0xff]   ;;  %v546_v18 = vld [vmem:[#allocation5 + $0x40] sm:$0xff]  }
  0x2c   :  { %v544_v16 = vld [vmem:[#allocation5 + $0x30] sm:$0xff]   ;;  %v547_v19 = vld [vmem:[#allocation5 + $0x48] sm:$0xff]   ;;  %v549_v21 = vld [vmem:[#allocation5 + $0x58] sm:$0xff]   ;;  %p605_p5 = por %p604_p4, %p603_p3 }
  0x2d   :  { %466 = vmatpush3.bf16.msra.mxu0 %v531_v2  ;;  %486 = vmatpush3.bf16.msra.mxu1 %v539_v6  ;;  %v548_v20 = vld [vmem:[#allocation5 + $0x50] sm:$0xff]   ;;  %v550_v22 = vld [vmem:[#allocation5 + $0x60] sm:$0xff]   ;;  %v551_v23 = vld [vmem:[#allocation5 + $0x68] sm:$0xff]  }
  0x2e   :  { %467 = vmatprep.subr.bf16.mxu0 %v630_v0  ;;  %487 = vmatprep.subr.bf16.mxu1 %v630_v0  ;;  %v408_v24 = vld [vmem:[%s743_s2] ss:$0 sm:$0xff]  ;;  %v553_v33 = vld [vmem:[#allocation5 + $0x78] sm:$0xff]   ;;  %v427_v42 = vld [vmem:[%s745_s4 + $0x1] ss:$0 sm:$0xff]  ;;  %p606_p6 = pnand %p605_p5, %p599_p2 }
  0x2f   :  { %v552_v32 = vld [vmem:[#allocation5 + $0x70] sm:$0xff]  }
  0x30   :  { %v417_v34 = vld [vmem:[%s745_s4] ss:$0 sm:$0xff] }
  0x31   :  { %468 = vmatpush3.bf16.msra.mxu0 %v532_v3  ;;  %488 = vmatpush3.bf16.msra.mxu1 %v540_v8 }
  0x32   :  { %469 = vmatprep.subr.bf16.mxu0 %v630_v0  ;;  %489 = vmatprep.subr.bf16.mxu1 %v630_v0 }
  0x35   :  { %470 = vmatpush3.bf16.msra.mxu0 %v533_v5  ;;  %490 = vmatpush3.bf16.msra.mxu1 %v541_v10 }
  0x36   :  { %471 = vmatprep.subr.bf16.mxu0 %v630_v0  ;;  %491 = vmatprep.subr.bf16.mxu1 %v630_v0 }
  0x39   :  { %472 = vmatpush3.bf16.msra.mxu0 %v534_v7  ;;  %492 = vmatpush3.bf16.msra.mxu1 %v542_v12 }
  0x3a   :  { %473 = vmatprep.subr.bf16.mxu0 %v630_v0  ;;  %493 = vmatprep.subr.bf16.mxu1 %v630_v0 }
  0x3d   :  { %474 = vmatpush3.bf16.msra.mxu0 %v535_v9  ;;  %494 = vmatpush3.bf16.msra.mxu1 %v543_v14 }
  0x3e   :  { %475 = vmatprep.subr.bf16.mxu0 %v630_v0  ;;  %495 = vmatprep.subr.bf16.mxu1 %v630_v0 }
  0x41   :  { %476 = vmatpush3.bf16.msra.mxu0 %v536_v11  ;;  %496 = vmatpush3.bf16.msra.mxu1 %v544_v16 }
  0x42   :  { %477 = vmatprep.subr.bf16.mxu0 %v630_v0  ;;  %497 = vmatprep.subr.bf16.mxu1 %v630_v0 }
  0x45   :  { %478 = vmatpush3.bf16.msra.mxu0 %v537_v13  ;;  %498 = vmatpush3.bf16.msra.mxu1 %v545_v17 }
  0x46   :  { %503 = vmatprep.subr.bf16.mxu0 %v630_v0 }
  0x48   :  { %480 = vmatmul.mubr.bf16.vlgmr.msra.gmra.mrb[0].mxu0 %v50_v15 }
  0x49   :  { %519 = vmatprep.mubr.msk.bf16.mxu0 %vm631_vm0, %v630_v0  ;;  %504 = vmatpush3.bf16.msra.mxu0 %v546_v18 }
  0x4a   :  { %505 = vmatprep.subr.bf16.mxu0 %v630_v0 }
  0x4d   :  { %506 = vmatpush3.bf16.msra.mxu0 %v547_v19 }
  0x4e   :  { %507 = vmatprep.subr.bf16.mxu0 %v630_v0 }
  0x51   :  { %508 = vmatpush3.bf16.msra.mxu0 %v548_v20 }
  0x52   :  { %509 = vmatprep.subr.bf16.mxu0 %v630_v0 }
  0x55   :  { %510 = vmatpush3.bf16.msra.mxu0 %v549_v21 }
  0x56   :  { %511 = vmatprep.subr.bf16.mxu0 %v630_v0 }
  0x59   :  { %512 = vmatpush3.bf16.msra.mxu0 %v550_v22 }
  0x5a   :  { %513 = vmatprep.subr.bf16.mxu0 %v630_v0 }
  0x5d   :  { %514 = vmatpush3.bf16.msra.mxu0 %v551_v23 }
  0x5e   :  { %515 = vmatprep.subr.bf16.mxu0 %v630_v0 }
  0x61   :  { %516 = vmatpush3.bf16.msra.mxu0 %v552_v32 }
  0x62   :  { %517 = vmatprep.subr.bf16.mxu0 %v630_v0 }
  0x65   :  { %518 = vmatpush3.bf16.msra.mxu0 %v553_v33 }
 0x11b   :  { %v156_v25 = vpop.f32.mrb[0].mxu0 }
 0x11c   :  { %v157_v26 = vadd.f32 %v408_v24, %v156_v25  ;;  %v481_v27 = vpop.f32.mrb[1].mxu0 }
 0x11d   :  { %v159_v28 = vpop.f32.mrb[2].mxu0 }
 0x11e   :  { %v162_v29 = vmax.f32 %v157_v26, 0.0  ;;  %v482_v30 = vpop.f32.mrb[3].mxu0 }
 0x120   :  { %v163_v31 = vpack.c.bf16 %v162_v29, %v162_v29 }
 0x122   :  { %500 = vmatmul.mubr.bf16.vlgmr.msra.gmra.mrb[0].mxu1 %v163_v31 }
 0x1f5   :  { %v269_v35 = vpop.f32.mrb[0].mxu1 }
 0x1f6   :  { %v270_v36 = vadd.f32 %v417_v34, %v269_v35  ;;  %v501_v37 = vpop.f32.mrb[1].mxu1 }
 0x1f7   :  { %v272_v38 = vpop.f32.mrb[2].mxu1 }
 0x1f8   :  { %v275_v39 = vmax.f32 %v270_v36, 0.0  ;;  %v502_v40 = vpop.f32.mrb[3].mxu1 }
 0x1fa   :  { %v276_v41 = vpack.c.bf16 %v275_v39, %v275_v39 }
 0x1fc   :  { %520 = vmatmul.mubr.bf16.vlgmr.msra.gmra.mrb[4].mxu0 %v276_v41 }
 0x2cf   :  { %v384_v43 = vpop.f32.mrb[4].mxu0 }
 0x2d0   :  { %v385_v44 = vadd.f32 %v427_v42, %v384_v43  ;;  %v521_v45 = vpop.f32.mrb[5].mxu0 }
 0x2d1   :  { %v387_v46 = vpop.f32.mrb[6].mxu0 }
 0x2d2   :  { %v390_v47 = vmax.f32 %v385_v44, 0.0  ;;  %v522_v48 = vpop.f32.mrb[7].mxu0 }
 0x2d4   :  { %391 = vst [vmem:[#allocation7] sm:$0xff] %v390_v47 }
 0x2d5   :  { %609 = shalt.err (!%p606_p6)
}
 0x2d6   :  { %s610_s4 = scalar_lea.hbm %s746_s5, 128 }
 0x2d7   :  { %p611_p7 = scmp.ne.s32.totalorder %s746_s5, %s610_s4  ;;  %p614_p8 = scmp.lt.u32.totalorder %s610_s4, %s746_s5 }
 0x2d9   :  { %p616_p9 = pnand %p614_p8, %p611_p7 }
 0x2db   :  { %619 = shalt.err (!%p616_p9)
}
 0x2dc   :  { %401 = dma.vmem_to_hbm [thread:$0]  %s399_s24, 128, %s746_s5, [#allocation4]  }
 0x2dd   :  { %624 = dma.done.wait [#allocation4], 128  }
 0x2de   :  { %625 = vsyncadd [#allocation4], 4294967168 }
 0x2df   :  { %405 = vsyncpa [#allocation3], 1 }
 0x2e0   :  { %406 = vsyncpa [#allocation6], 1 }
 0x2e1   :  { %407 = vsyncpa [#allocation4], 1 }

</bundles_post_ra>
